<compile_context>
chip_gen: v7x
topology: tpu7x:2x2x1
jax: 0.10.0
libtpu: 0.0.40
codegen_flags: <defaults>
</compile_context>

<pallas_src>
import functools

import jax
import jax.numpy as jnp
from jax.experimental import pallas as pl
from jax.experimental.pallas import tpu as pltpu


def _round_up(x: int, m: int) -> int:
    return (x + m - 1) // m * m


def _cdiv(a: int, b: int) -> int:
    return (a + b - 1) // b


def decoder_kernel(z_ref, w2_ref, b2_ref, w3_ref, b3_ref, out_ref, *, bf16_eup):
    """One batch tile of y = sigmoid(fc3(tanh(fc2(z)))).

    Weights arrive pre-transposed (in, out), hidden dim zero-padded to 512
    lanes, stored in bf16; biases are fp32 rows broadcast over the batch.
    Both matmuls accumulate in fp32 on the MXU; tanh/sigmoid use the EUP.
    """
    # fc2: [TM, z_dim] @ [z_dim, Hp] + b2   (bf16 operands, fp32 accumulate)
    a = jnp.dot(z_ref[...].astype(w2_ref.dtype), w2_ref[...],
                preferred_element_type=jnp.float32)
    a = a + b2_ref[...]
    if bf16_eup:
        # v6e/v7x: bf16 EUP is ~2x; this also *is* the bf16 cast fc3 needs.
        h = jnp.tanh(a.astype(jnp.bfloat16))
    else:
        # v5e: no bf16 EUP/VPU -> fp32 transcendental, cast afterwards.
        h = jnp.tanh(a).astype(jnp.bfloat16)

    # fc3: [TM, Hp] @ [Hp, 784] + b3        (bf16 operands, fp32 accumulate)
    c = jnp.dot(h, w3_ref[...], preferred_element_type=jnp.float32)
    c = c + b3_ref[...]

    # sigmoid(x) = 0.5 * tanh(0.5 x) + 0.5  -> transcendental stays on the EUP
    if bf16_eup:
        t = jnp.tanh((0.5 * c).astype(jnp.bfloat16))
    else:
        t = jnp.tanh(0.5 * c)
    out_ref[...] = (0.5 * t + 0.5).astype(out_ref.dtype)


def pack_decoder_params(w2, b2, w3, b3, weight_dtype=jnp.bfloat16):
    """Zero-pad the hidden dim to a multiple of 128 lanes and cast weights.

    w2:(z_dim,H)  b2:(1,H)  w3:(H,O)  b3:(1,O)   (already (in,out) layout)
    Padded hidden units see zero weights + zero bias -> tanh(0) = 0, and the
    zero-padded w3 rows contribute nothing, so results are exact modulo the
    bf16 weight cast.  The output dim (784) is NOT padded: the kernel writes a
    full-width 784 block directly, avoiding any post-kernel slice copy.
    """
    z_dim, hidden = w2.shape
    hidden2, out = w3.shape
    assert hidden2 == hidden
    hp = _round_up(hidden, 128)   # 500 -> 512
    w2p = jnp.zeros((z_dim, hp), weight_dtype).at[:, :hidden].set(
        w2.astype(weight_dtype))
    b2p = jnp.zeros((1, hp), jnp.float32).at[:, :hidden].set(
        b2.astype(jnp.float32))
    w3p = jnp.zeros((hp, out), weight_dtype).at[:hidden, :].set(
        w3.astype(weight_dtype))
    b3p = b3.astype(jnp.float32).reshape(1, out)
    return w2p, b2p, w3p, b3p


@functools.partial(jax.jit, static_argnames=("block_m", "bf16_eup", "out_dtype"))
def decoder_forward(z, w2p, b2p, w3p, b3p, *, block_m=None, bf16_eup=None,
                    out_dtype=jnp.bfloat16):
    """z: [B, z_dim] fp32; padded/packed params from pack_decoder_params.

    Returns [B, 784] in `out_dtype` (bf16 by default to halve HBM writeback;
    pass out_dtype=jnp.float32 if the consumer needs full precision output).
    """
    B, z_dim = z.shape
    hp = w2p.shape[1]
    out_dim = w3p.shape[1]

    # Trace-time hardware detection for the per-generation defaults.
    if bf16_eup is None or block_m is None:
        try:
            kind = jax.devices()[0].device_kind.lower()
        except Exception:  # pragma: no cover - be permissive about detection
            kind = ""
        if bf16_eup is None:
            bf16_eup = "v5" not in kind            # v5e: no bf16 EUP/VPU
        if block_m is None:
            block_m = 1024 if ("v7" in kind or "7x" in kind) else 256

    # Adaptive batch tiling: fix the tile count first so padding never exceeds
    # 7 rows per tile (avoids a mostly-garbage tail tile for awkward B).
    num_tiles = max(1, _cdiv(B, block_m))
    tm = _round_up(_cdiv(B, num_tiles), 8)
    b_pad = num_tiles * tm
    if b_pad != B:
        z = jnp.pad(z, ((0, b_pad - B), (0, 0)))

    out_bytes = jnp.dtype(out_dtype).itemsize
    cost = pl.CostEstimate(
        flops=2 * b_pad * (z_dim * hp + hp * out_dim),
        transcendentals=b_pad * (hp + out_dim),
        bytes_accessed=(z.size * z.dtype.itemsize
                        + w2p.size * w2p.dtype.itemsize + b2p.size * 4
                        + w3p.size * w3p.dtype.itemsize + b3p.size * 4
                        + b_pad * out_dim * out_bytes),
    )

    kernel = functools.partial(decoder_kernel, bf16_eup=bf16_eup)

    out = pl.pallas_call(
        kernel,
        out_shape=jax.ShapeDtypeStruct((b_pad, out_dim), out_dtype),
        grid=(num_tiles,),
        in_specs=[
            pl.BlockSpec((tm, z_dim), lambda i: (i, 0)),     # batch tile of z
            pl.BlockSpec((z_dim, hp), lambda i: (0, 0)),     # w2: VMEM-resident
            pl.BlockSpec((1, hp), lambda i: (0, 0)),         # b2
            pl.BlockSpec((hp, out_dim), lambda i: (0, 0)),   # w3: VMEM-resident
            pl.BlockSpec((1, out_dim), lambda i: (0, 0)),    # b3
        ],
        # Full 784-wide output block (== full last dim): no padded columns, no
        # post-kernel slice copy; only the last 16-lane group is a masked vst.
        out_specs=pl.BlockSpec((tm, out_dim), lambda i: (i, 0)),
        compiler_params=pltpu.CompilerParams(
            dimension_semantics=("parallel",)),
        cost_estimate=cost,
    )(z, w2p, b2p, w3p, b3p)

    # Only strip batch padding when there is any (no-op copy avoided otherwise).
    if b_pad != B:
        out = out[:B]
    return out


def init_decoder_params(key, z_dim=20, hidden_dim=500, input_dim=28 * 28):
    """Deterministic init mirroring torch.nn.Linear default:
    U(-1/sqrt(fan_in), 1/sqrt(fan_in)) for both weight and bias.
    Stored as (in, out) = transpose of PyTorch's (out, in) layout."""
    k1, k2, k3, k4 = jax.random.split(key, 4)
    bound2 = 1.0 / float(z_dim) ** 0.5
    bound3 = 1.0 / float(hidden_dim) ** 0.5
    w2 = jax.random.uniform(k1, (z_dim, hidden_dim), jnp.float32, -bound2, bound2)
    b2 = jax.random.uniform(k2, (1, hidden_dim), jnp.float32, -bound2, bound2)
    w3 = jax.random.uniform(k3, (hidden_dim, input_dim), jnp.float32, -bound3, bound3)
    b3 = jax.random.uniform(k4, (1, input_dim), jnp.float32, -bound3, bound3)
    return w2, b2, w3, b3


def decoder_ref(z, w2, b2, w3, b3):
    h = jnp.tanh(z @ w2 + b2)
    return jax.nn.sigmoid(h @ w3 + b3)


if __name__ == "__main__":
    key = jax.random.PRNGKey(0)
    kz, kp = jax.random.split(key)

    batch, z_dim, hidden_dim, input_dim = 8, 20, 500, 28 * 28
    z = jax.random.normal(kz, (batch, z_dim), jnp.float32)
    w2, b2, w3, b3 = init_decoder_params(kp, z_dim, hidden_dim, input_dim)
    w2p, b2p, w3p, b3p = pack_decoder_params(w2, b2, w3, b3)

    y = decoder_forward(z, w2p, b2p, w3p, b3p)
    y = jax.block_until_ready(y)

    # Sanity check against a pure-JAX fp32 reference.  bf16 weights + bf16
    # transcendentals + bf16 output shift results at the ~1e-2 level, so the
    # tolerance is loosened accordingly (verify downstream VAE loss tolerance
    # before adopting bf16 end-to-end in training).
    y32 = y.astype(jnp.float32)
    y_ref = decoder_ref(z, w2, b2, w3, b3)
    assert y.shape == (batch, input_dim)
    max_err = float(jnp.max(jnp.abs(y32 - y_ref)))
    assert jnp.allclose(y32, y_ref, atol=3e-2, rtol=3e-2), max_err

    print("KERNEL_OK")
</pallas_src>

<mosaic_0001>
module attributes {stable_mosaic.version = 11 : i64} {
  func.func @decoder_kernel(%arg0: i32, %arg1: memref<8x20xf32, #tpu.memory_space<vmem>>, %arg2: memref<20x512xbf16, #tpu.memory_space<vmem>>, %arg3: memref<1x512xf32, #tpu.memory_space<vmem>>, %arg4: memref<512x784xbf16, #tpu.memory_space<vmem>>, %arg5: memref<1x784xf32, #tpu.memory_space<vmem>>, %arg6: memref<8x784xbf16, #tpu.memory_space<vmem>>) attributes {dimension_semantics = [#tpu.dimension_semantics<parallel>], iteration_bounds = array<i64: 1>, scalar_prefetch = 0 : i64, scratch_operands = 0 : i64, tpu.core_type = #tpu.core_type<tc>, window_params = [{transform_indices = @transform_0, window_bounds = array<i64: 8, 20>}, {pipeline_mode = #tpu.pipeline_mode<synchronous>, transform_indices = @transform_1, window_bounds = array<i64: 20, 512>}, {pipeline_mode = #tpu.pipeline_mode<synchronous>, transform_indices = @transform_2, window_bounds = array<i64: 1, 512>}, {pipeline_mode = #tpu.pipeline_mode<synchronous>, transform_indices = @transform_3, window_bounds = array<i64: 512, 784>}, {pipeline_mode = #tpu.pipeline_mode<synchronous>, transform_indices = @transform_4, window_bounds = array<i64: 1, 784>}, {transform_indices = @transform_5, window_bounds = array<i64: 8, 784>}]} {
    %c0 = arith.constant 0 : index
    %c0_0 = arith.constant 0 : index
    %0 = vector.load %arg1[%c0, %c0_0] : memref<8x20xf32, #tpu.memory_space<vmem>>, vector<8x20xf32>
    %1 = arith.truncf %0 : vector<8x20xf32> to vector<8x20xbf16>
    %c0_1 = arith.constant 0 : index
    %c0_2 = arith.constant 0 : index
    %2 = vector.load %arg2[%c0_1, %c0_2] : memref<20x512xbf16, #tpu.memory_space<vmem>>, vector<20x512xbf16>
    %cst = arith.constant dense<0.000000e+00> : vector<8x512xf32>
    %3 = tpu.matmul %1, %2, %cst {dimension_numbers = #tpu.dot_dimension_numbers<[1], [0], [0], [1], [0, 0, 1, 1], [], []>} : vector<8x20xbf16>, vector<20x512xbf16>, vector<8x512xf32> -> vector<8x512xf32>
    %c0_3 = arith.constant 0 : index
    %c0_4 = arith.constant 0 : index
    %4 = vector.load %arg3[%c0_3, %c0_4] : memref<1x512xf32, #tpu.memory_space<vmem>>, vector<1x512xf32>
    %5 = vector.broadcast %4 : vector<1x512xf32> to vector<8x512xf32>
    %6 = arith.addf %3, %5 : vector<8x512xf32>
    %7 = arith.truncf %6 : vector<8x512xf32> to vector<8x512xbf16>
    %8 = math.tanh %7 : vector<8x512xbf16>
    %c0_5 = arith.constant 0 : index
    %c0_6 = arith.constant 0 : index
    %9 = vector.load %arg4[%c0_5, %c0_6] : memref<512x784xbf16, #tpu.memory_space<vmem>>, vector<512x784xbf16>
    %cst_7 = arith.constant dense<0.000000e+00> : vector<8x784xf32>
    %10 = tpu.matmul %8, %9, %cst_7 {dimension_numbers = #tpu.dot_dimension_numbers<[1], [0], [0], [1], [0, 0, 1, 1], [], []>} : vector<8x512xbf16>, vector<512x784xbf16>, vector<8x784xf32> -> vector<8x784xf32>
    %c0_8 = arith.constant 0 : index
    %c0_9 = arith.constant 0 : index
    %11 = vector.load %arg5[%c0_8, %c0_9] : memref<1x784xf32, #tpu.memory_space<vmem>>, vector<1x784xf32>
    %12 = vector.broadcast %11 : vector<1x784xf32> to vector<8x784xf32>
    %13 = arith.addf %10, %12 : vector<8x784xf32>
    %cst_10 = arith.constant 5.000000e-01 : f32
    %14 = vector.broadcast %cst_10 : f32 to vector<8x784xf32>
    %15 = arith.mulf %14, %13 : vector<8x784xf32>
    %16 = arith.truncf %15 : vector<8x784xf32> to vector<8x784xbf16>
    %17 = math.tanh %16 : vector<8x784xbf16>
    %cst_11 = arith.constant 5.000000e-01 : bf16
    %18 = vector.broadcast %cst_11 : bf16 to vector<8x784xbf16>
    %19 = arith.mulf %18, %17 : vector<8x784xbf16>
    %cst_12 = arith.constant 5.000000e-01 : bf16
    %20 = vector.broadcast %cst_12 : bf16 to vector<8x784xbf16>
    %21 = arith.addf %19, %20 : vector<8x784xbf16>
    %c0_13 = arith.constant 0 : index
    %c0_14 = arith.constant 0 : index
    %22 = vector.load %arg6[%c0_13, %c0_14] : memref<8x784xbf16, #tpu.memory_space<vmem>>, vector<8x784xbf16>
    tpu.vector_store %arg6[%c0_13, %c0_14], %21 {strides = array<i32>} : memref<8x784xbf16, #tpu.memory_space<vmem>>, vector<8x784xbf16>,
    return
  }
  func.func @transform_0(%arg0: i32) -> (i32, i32) {
    %c0_i32 = arith.constant 0 : i32
    %c0_i32_0 = arith.constant 0 : i32
    return %arg0, %c0_i32 : i32, i32
  }
  func.func @transform_1(%arg0: i32) -> (i32, i32) {
    %c0_i32 = arith.constant 0 : i32
    %c0_i32_0 = arith.constant 0 : i32
    %c0_i32_1 = arith.constant 0 : i32
    return %c0_i32, %c0_i32_0 : i32, i32
  }
  func.func @transform_2(%arg0: i32) -> (i32, i32) {
    %c0_i32 = arith.constant 0 : i32
    %c0_i32_0 = arith.constant 0 : i32
    %c0_i32_1 = arith.constant 0 : i32
    return %c0_i32, %c0_i32_0 : i32, i32
  }
  func.func @transform_3(%arg0: i32) -> (i32, i32) {
    %c0_i32 = arith.constant 0 : i32
    %c0_i32_0 = arith.constant 0 : i32
    %c0_i32_1 = arith.constant 0 : i32
    return %c0_i32, %c0_i32_0 : i32, i32
  }
  func.func @transform_4(%arg0: i32) -> (i32, i32) {
    %c0_i32 = arith.constant 0 : i32
    %c0_i32_0 = arith.constant 0 : i32
    %c0_i32_1 = arith.constant 0 : i32
    return %c0_i32, %c0_i32_0 : i32, i32
  }
  func.func @transform_5(%arg0: i32) -> (i32, i32) {
    %c0_i32 = arith.constant 0 : i32
    %c0_i32_0 = arith.constant 0 : i32
    return %arg0, %c0_i32 : i32, i32
  }
}

</mosaic_0001>

<bundles_post_ra>
// kernel: decoder_forward.1
= control target key start
LH: loop header
LB: loop body
LE: loop exit
PB: predicated region body
PF: predicated region fallthrough
CT: control target
= control target key end

     0   :  { %vm87_vm0 = vcmask 1041408   ;;  %v2717_v3 = vmov 0   ;;  %vm83_vm1 = vcmask 162816   ;;  %s3533_s0 = inlined_call_operand.vmem [shape: f32[8,20], index: 0, kind: input, shape index: {}]   ;;  %s3534_s1 = inlined_call_operand.vmem [shape: bf16[20,512], index: 1, kind: input, shape index: {}]   ;;  %s3535_s2 = inlined_call_operand.vmem [shape: f32[1,512], index: 2, kind: input, shape index: {}]   ;;  %s3536_s3 = inlined_call_operand.vmem [shape: bf16[512,784], index: 3, kind: input, shape index: {}]   ;;  %s3537_s4 = inlined_call_operand.vmem [shape: f32[1,784], index: 4, kind: input, shape index: {}]   ;;  %s3538_s5 = inlined_call_operand.hbm [shape: bf16[8,784], index: 5, kind: output, shape index: {}]  }
   0x1   :  { %v2341_v0 = vld [vmem:[%s3534_s1 + $0x4] ss:$16 sps:$4 sm:$0xff]   ;;  %v2343_v1 = vld [vmem:[%s3534_s1] ss:$16 sps:$4 sm:$0xff]   ;;  %132 = vmatprep.mubr.bf16.mxu1 %v2717_v3  ;;  %v2348_v7 = vld [vmem:[%s3534_s1 + $0xc] ss:$16 sps:$4 sm:$0xff]  }
   0x2   :  { %v29_v2 = vld [vmem:[%s3534_s1 + $0x20] sm:$0x33]  ;;  %100 = vmatprep.subr.bf16.mxu1 %v2341_v0  ;;  %v2346_v10 = vld [vmem:[%s3534_s1 + $0x8] ss:$16 sps:$4 sm:$0xff]   ;;  %v2363_v18 = vld [vmem:[%s3536_s3 + $0x74] ss:$28 sps:$4 sm:$0xff]  }
   0x3   :  { %v2042_v4 = vcombine.high %v29_v2, %v29_v2  ;;  %v2041_v5 = vcombine.low %v29_v2, %v29_v2  ;;  %101 = vmatpush1.bf16.msra.mxu1 %v2343_v1  ;;  %v23_v6 = vld [vmem:[%s3533_s0] sm:$0xff]  ;;  %v30_v11 = vld [vmem:[%s3534_s1 + $0x28] sm:$0x33]  ;;  %v2357_v14 = vld [vmem:[%s3536_s3 + $0x3c] ss:$28 sps:$4 sm:$0xff]  }
   0x4   :  { %v2351_v9 = vld [vmem:[%s3536_s3 + $0x4] ss:$28 sps:$4 sm:$0xff]   ;;  %v24_v12 = vpack.c.bf16 %v23_v6, %v23_v6  ;;  %v2044_v15 = vcombine.high %v30_v11, %v30_v11  ;;  %v2043_v16 = vcombine.low %v30_v11, %v30_v11  ;;  %v2362_v17 = vld [vmem:[%s3536_s3 + $0x38] ss:$28 sps:$4 sm:$0xff]   ;;  %v2355_v19 = vld [vmem:[%s3536_s3 + $0xc] ss:$28 sps:$4 sm:$0xff]  }
   0x5   :  { %2045 = vmatprep.subr.msk.bf16.mxu1 %vm87_vm0, %v2042_v4  ;;  %v89_v8 = vsel %vm87_vm0, %v2041_v5, 0  ;;  %1635 = vmatprep.subr.bf16.mxu0 %v2351_v9  ;;  %v2356_v13 = vld [vmem:[%s3536_s3] ss:$28 sps:$4 sm:$0xff]   ;;  %v2368_v21 = vld [vmem:[%s3536_s3 + $0x70] ss:$28 sps:$4 sm:$0xff]  }
   0x6   :  { %1636 = vmatpush1.bf16.msra.mxu0 %v2356_v13  ;;  %v95_v20 = vsel %vm87_vm0, %v2043_v16, 0  ;;  %v2369_v22 = vld [vmem:[%s3536_s3 + $0xac] ss:$28 sps:$4 sm:$0xff]   ;;  %v2361_v24 = vld [vmem:[%s3536_s3 + $0x44] ss:$28 sps:$4 sm:$0xff]  }
   0x7   :  { %103 = vmatpush1.bf16.msra.mxu1 %v89_v8  ;;  %1637 = vmatprep.subr.bf16.mxu0 %v2357_v14  ;;  %v2353_v23 = vld [vmem:[%s3536_s3 + $0x8] ss:$28 sps:$4 sm:$0xff]   ;;  %v2359_v27 = vld [vmem:[%s3536_s3 + $0x40] ss:$28 sps:$4 sm:$0xff]   ;;  %v2365_v31 = vld [vmem:[%s3536_s3 + $0x78] ss:$28 sps:$4 sm:$0xff]  }
   0x8   :  { %141 = vmatprep.subr.bf16.mxu1 %v2348_v7  ;;  %v2374_v25 = vld [vmem:[%s3536_s3 + $0xa8] ss:$28 sps:$4 sm:$0xff]   ;;  %v2367_v28 = vld [vmem:[%s3536_s3 + $0x7c] ss:$28 sps:$4 sm:$0xff]   ;;  %v2373_v32 = vld [vmem:[%s3536_s3 + $0xb4] ss:$28 sps:$4 sm:$0xff]  }
   0x9   :  { %v2375_v26 = vld [vmem:[%s3536_s3 + $0xe4] ss:$28 sps:$4 sm:$0xff]   ;;  %v2381_v30 = vld [vmem:[%s3536_s3 + $0x11c] ss:$28 sps:$4 sm:$0xff]   ;;  %v2387_v34 = vld [vmem:[%s3536_s3 + $0x154] ss:$28 sps:$4 sm:$0xff]  }
   0xa   :  { %2046 = vmatmul.mubr.msk.bf16.vlgmr.msra.gmra.mrb[0].mxu1 %vm83_vm1, %v24_v12  ;;  %1638 = vmatpush1.bf16.msra.mxu0 %v2362_v17  ;;  %v2380_v29 = vld [vmem:[%s3536_s3 + $0xe0] ss:$28 sps:$4 sm:$0xff]   ;;  %v2386_v33 = vld [vmem:[%s3536_s3 + $0x118] ss:$28 sps:$4 sm:$0xff]   ;;  %v2371_v35 = vld [vmem:[%s3536_s3 + $0xb0] ss:$28 sps:$4 sm:$0xff]  }
   0xb   :  { %142 = vmatpush1.bf16.msra.mxu1 %v2346_v10  ;;  %173 = vmatprep.mubr.bf16.mxu1 %v2717_v3  ;;  %v2379_v36 = vld [vmem:[%s3536_s3 + $0xec] ss:$28 sps:$4 sm:$0xff]   ;;  %v2385_v40 = vld [vmem:[%s3536_s3 + $0x124] ss:$28 sps:$4 sm:$0xff]   ;;  %v2391_v44 = vld [vmem:[%s3536_s3 + $0x15c] ss:$28 sps:$4 sm:$0xff]  }
   0xc   :  { %2047 = vmatprep.subr.msk.bf16.mxu1 %vm87_vm0, %v2044_v15  ;;  %1639 = vmatprep.subr.bf16.mxu0 %v2363_v18  ;;  %v2392_v37 = vld [vmem:[%s3536_s3 + $0x150] ss:$28 sps:$4 sm:$0xff]   ;;  %v2377_v39 = vld [vmem:[%s3536_s3 + $0xe8] ss:$28 sps:$4 sm:$0xff]   ;;  %v2383_v43 = vld [vmem:[%s3536_s3 + $0x120] ss:$28 sps:$4 sm:$0xff]  }
   0xd   :  { %v2393_v38 = vld [vmem:[%s3536_s3 + $0x18c] ss:$28 sps:$4 sm:$0xff]   ;;  %v2399_v42 = vld [vmem:[%s3536_s3 + $0x1c4] ss:$28 sps:$4 sm:$0xff]   ;;  %v2405_v46 = vld [vmem:[%s3536_s3 + $0x1fc] ss:$28 sps:$4 sm:$0xff]  }
   0xe   :  { %1640 = vmatpush1.bf16.msra.mxu0 %v2368_v21  ;;  %v2398_v41 = vld [vmem:[%s3536_s3 + $0x188] ss:$28 sps:$4 sm:$0xff]   ;;  %v2404_v45 = vld [vmem:[%s3536_s3 + $0x1c0] ss:$28 sps:$4 sm:$0xff]   ;;  %v2389_v47 = vld [vmem:[%s3536_s3 + $0x158] ss:$28 sps:$4 sm:$0xff]  }
   0xf   :  { %144 = vmatpush1.bf16.msra.mxu1 %v95_v20  ;;  %1641 = vmatprep.subr.bf16.mxu0 %v2369_v22  ;;  %v2397_v48 = vld [vmem:[%s3536_s3 + $0x194] ss:$28 sps:$4 sm:$0xff]   ;;  %v2403_v52 = vld [vmem:[%s3536_s3 + $0x1cc] ss:$28 sps:$4 sm:$0xff]   ;;  %v2409_v56 = vld [vmem:[%s3536_s3 + $0x204] ss:$28 sps:$4 sm:$0xff]  }
  0x10   :  { %1717 = vmatprep.subr.bf16.mxu1 %v2355_v19  ;;  %v2410_v49 = vld [vmem:[%s3536_s3 + $0x1f8] ss:$28 sps:$4 sm:$0xff]   ;;  %v2395_v51 = vld [vmem:[%s3536_s3 + $0x190] ss:$28 sps:$4 sm:$0xff]   ;;  %v2401_v55 = vld [vmem:[%s3536_s3 + $0x1c8] ss:$28 sps:$4 sm:$0xff]  }
  0x11   :  { %v2411_v50 = vld [vmem:[%s3536_s3 + $0x234] ss:$28 sps:$4 sm:$0xff]   ;;  %v2417_v54 = vld [vmem:[%s3536_s3 + $0x26c] ss:$28 sps:$4 sm:$0xff]   ;;  %v2407_v58 = vld [vmem:[%s3536_s3 + $0x200] ss:$28 sps:$4 sm:$0xff]  }
  0x12   :  { %2048 = vmatmul.mubr.msk.bf16.vlgmr.msra.gmra.mrb[4].mxu1 %vm83_vm1, %v24_v12  ;;  %1642 = vmatpush1.bf16.msra.mxu0 %v2374_v25  ;;  %v2416_v53 = vld [vmem:[%s3536_s3 + $0x230] ss:$28 sps:$4 sm:$0xff]   ;;  %v2422_v57 = vld [vmem:[%s3536_s3 + $0x268] ss:$28 sps:$4 sm:$0xff]   ;;  %v2415_v59 = vld [vmem:[%s3536_s3 + $0x23c] ss:$28 sps:$4 sm:$0xff]  }
  0x13   :  { %1718 = vmatpush1.bf16.msra.mxu1 %v2353_v23  ;;  %1643 = vmatprep.subr.bf16.mxu0 %v2375_v26  ;;  %v2413_v60 = vld [vmem:[%s3536_s3 + $0x238] ss:$28 sps:$4 sm:$0xff]   ;;  %v2419_v62 = vld [vmem:[%s3536_s3 + $0x270] ss:$28 sps:$4 sm:$0xff]   ;;  %v2423_v63 = vld [vmem:[%s3536_s3 + $0x2a4] ss:$28 sps:$4 sm:$0xff]  }
  0x14   :  { %1719 = vmatprep.subr.bf16.mxu1 %v2361_v24  ;;  %v2421_v61 = vld [vmem:[%s3536_s3 + $0x274] ss:$28 sps:$4 sm:$0xff]   ;;  %v2427_v0 = vld [vmem:[%s3536_s3 + $0x2ac] ss:$28 sps:$4 sm:$0xff]   ;;  %v2428_v2 = vld [vmem:[%s3536_s3 + $0x2a0] ss:$28 sps:$4 sm:$0xff]  }
  0x15   :  { %v2425_v1 = vld [vmem:[%s3536_s3 + $0x2a8] ss:$28 sps:$4 sm:$0xff]   ;;  %v2429_v3 = vld [vmem:[%s3536_s3 + $0x2dc] ss:$28 sps:$4 sm:$0xff]   ;;  %v2435_v7 = vld [vmem:[%s3536_s3 + $0x314] ss:$28 sps:$4 sm:$0xff]  }
  0x16   :  { %1644 = vmatpush1.bf16.msra.mxu0 %v2380_v29  ;;  %v2433_v4 = vld [vmem:[%s3536_s3 + $0x2e4] ss:$28 sps:$4 sm:$0xff]   ;;  %v2434_v6 = vld [vmem:[%s3536_s3 + $0x2d8] ss:$28 sps:$4 sm:$0xff]   ;;  %v2440_v10 = vld [vmem:[%s3536_s3 + $0x310] ss:$28 sps:$4 sm:$0xff]  }
  0x17   :  { %1720 = vmatpush1.bf16.msra.mxu1 %v2359_v27  ;;  %1645 = vmatprep.subr.bf16.mxu0 %v2381_v30  ;;  %v2431_v5 = vld [vmem:[%s3536_s3 + $0x2e0] ss:$28 sps:$4 sm:$0xff]   ;;  %v2437_v9 = vld [vmem:[%s3536_s3 + $0x318] ss:$28 sps:$4 sm:$0xff]   ;;  %v2441_v11 = vld [vmem:[%s3536_s3 + $0x34c] ss:$28 sps:$4 sm:$0xff]  }
  0x18   :  { %1721 = vmatprep.subr.bf16.mxu1 %v2367_v28  ;;  %v2439_v8 = vld [vmem:[%s3536_s3 + $0x31c] ss:$28 sps:$4 sm:$0xff]   ;;  %v2445_v12 = vld [vmem:[%s3536_s3 + $0x354] ss:$28 sps:$4 sm:$0xff]   ;;  %v2446_v14 = vld [vmem:[%s3536_s3 + $0x348] ss:$28 sps:$4 sm:$0xff]  }
  0x19   :  { %v2443_v13 = vld [vmem:[%s3536_s3 + $0x350] ss:$28 sps:$4 sm:$0xff]   ;;  %v2449_v15 = vld [vmem:[%s3536_s3 + $0x384] ss:$28 sps:$4 sm:$0xff]  }
  0x1a   :  { %1646 = vmatpush1.bf16.msra.mxu0 %v2386_v33  ;;  %v2452_v16 = vld [vmem:[%s3536_s3 + $0x38c] ss:$28 sps:$4 sm:$0xff]  }
  0x1b   :  { %1722 = vmatpush1.bf16.msra.mxu1 %v2365_v31  ;;  %1647 = vmatprep.subr.bf16.mxu0 %v2387_v34 }
  0x1c   :  { %1723 = vmatprep.subr.bf16.mxu1 %v2373_v32 }
  0x1e   :  { %1648 = vmatpush1.bf16.msra.mxu0 %v2392_v37 }
  0x1f   :  { %1724 = vmatpush1.bf16.msra.mxu1 %v2371_v35  ;;  %1649 = vmatprep.subr.bf16.mxu0 %v2393_v38 }
  0x20   :  { %1725 = vmatprep.subr.bf16.mxu1 %v2379_v36 }
  0x22   :  { %1650 = vmatpush1.bf16.msra.mxu0 %v2398_v41 }
  0x23   :  { %1726 = vmatpush1.bf16.msra.mxu1 %v2377_v39  ;;  %1651 = vmatprep.subr.bf16.mxu0 %v2399_v42 }
  0x24   :  { %1727 = vmatprep.subr.bf16.mxu1 %v2385_v40 }
  0x26   :  { %1652 = vmatpush1.bf16.msra.mxu0 %v2404_v45 }
  0x27   :  { %1728 = vmatpush1.bf16.msra.mxu1 %v2383_v43  ;;  %1653 = vmatprep.subr.bf16.mxu0 %v2405_v46 }
  0x28   :  { %1729 = vmatprep.subr.bf16.mxu1 %v2391_v44 }
  0x2a   :  { %1654 = vmatpush1.bf16.msra.mxu0 %v2410_v49 }
  0x2b   :  { %1730 = vmatpush1.bf16.msra.mxu1 %v2389_v47  ;;  %1655 = vmatprep.subr.bf16.mxu0 %v2411_v50 }
  0x2c   :  { %1731 = vmatprep.subr.bf16.mxu1 %v2397_v48 }
  0x2e   :  { %1656 = vmatpush1.bf16.msra.mxu0 %v2416_v53 }
  0x2f   :  { %1732 = vmatpush1.bf16.msra.mxu1 %v2395_v51  ;;  %1657 = vmatprep.subr.bf16.mxu0 %v2417_v54 }
  0x30   :  { %1733 = vmatprep.subr.bf16.mxu1 %v2403_v52 }
  0x32   :  { %1658 = vmatpush1.bf16.msra.mxu0 %v2422_v57 }
  0x33   :  { %1734 = vmatpush1.bf16.msra.mxu1 %v2401_v55  ;;  %1659 = vmatprep.subr.bf16.mxu0 %v2423_v63 }
  0x34   :  { %1735 = vmatprep.subr.bf16.mxu1 %v2409_v56 }
  0x36   :  { %1660 = vmatpush1.bf16.msra.mxu0 %v2428_v2 }
  0x37   :  { %1736 = vmatpush1.bf16.msra.mxu1 %v2407_v58  ;;  %1661 = vmatprep.subr.bf16.mxu0 %v2429_v3 }
  0x38   :  { %1737 = vmatprep.subr.bf16.mxu1 %v2415_v59 }
  0x3a   :  { %1662 = vmatpush1.bf16.msra.mxu0 %v2434_v6 }
  0x3b   :  { %1738 = vmatpush1.bf16.msra.mxu1 %v2413_v60  ;;  %1663 = vmatprep.subr.bf16.mxu0 %v2435_v7 }
  0x3c   :  { %1739 = vmatprep.subr.bf16.mxu1 %v2421_v61 }
  0x3e   :  { %1664 = vmatpush1.bf16.msra.mxu0 %v2440_v10 }
  0x3f   :  { %1740 = vmatpush1.bf16.msra.mxu1 %v2419_v62  ;;  %1665 = vmatprep.subr.bf16.mxu0 %v2441_v11 }
  0x40   :  { %1741 = vmatprep.subr.bf16.mxu1 %v2427_v0 }
  0x42   :  { %1666 = vmatpush1.bf16.msra.mxu0 %v2446_v14 }
  0x43   :  { %1742 = vmatpush1.bf16.msra.mxu1 %v2425_v1  ;;  %1676 = vmatprep.subr.bf16.mxu0 %v2449_v15 }
  0x44   :  { %1743 = vmatprep.subr.bf16.mxu1 %v2433_v4 }
  0x47   :  { %1744 = vmatpush1.bf16.msra.mxu1 %v2431_v5 }
  0x48   :  { %1745 = vmatprep.subr.bf16.mxu1 %v2439_v8 }
  0x4b   :  { %1746 = vmatpush1.bf16.msra.mxu1 %v2437_v9 }
  0x4c   :  { %1747 = vmatprep.subr.bf16.mxu1 %v2445_v12 }
  0x4f   :  { %1748 = vmatpush1.bf16.msra.mxu1 %v2443_v13 }
  0x50   :  { %1758 = vmatprep.subr.bf16.mxu1 %v2452_v16 }
  0x51   :  { %10 = vsyncpa [#allocation3], 0  ;;  %v33_v17 = vlaneseq  ;;  %v2980_v20 = vld [vmem:[%s3535_s2] sm:$0xf]  ;;  %v2450_v41 = vld [vmem:[%s3536_s3 + $0x388] ss:$28 sps:$4 sm:$0xff]  }
  0x52   :  { %v2447_v40 = vld [vmem:[%s3536_s3 + $0x380] ss:$28 sps:$4 sm:$0xff]   ;;  %v2453_v46 = vld [vmem:[%s3536_s3 + $0x3b8] ss:$28 sps:$4 sm:$0xff]   ;;  %v2459_v50 = vld [vmem:[%s3536_s3 + $0x3f0] ss:$28 sps:$4 sm:$0xff]  }
  0x53   :  { %v2974_v18 = vshrl.u32 %v33_v17, 7  ;;  %v2455_v43 = vld [vmem:[%s3536_s3 + $0x3bc] ss:$28 sps:$4 sm:$0xff]   ;;  %v2458_v44 = vld [vmem:[%s3536_s3 + $0x3c4] ss:$28 sps:$4 sm:$0xff]   ;;  %vm2021_vm2 = vcmask 125952  }
  0x54   :  { %v2456_v47 = vld [vmem:[%s3536_s3 + $0x3c0] ss:$28 sps:$4 sm:$0xff]   ;;  %v2461_v48 = vld [vmem:[%s3536_s3 + $0x3f4] ss:$28 sps:$4 sm:$0xff]   ;;  %v2467_v53 = vld [vmem:[%s3536_s3 + $0x42c] ss:$28 sps:$4 sm:$0xff]  }
  0x55   :  { %v35_v19 = vsub.s32 0, %v2974_v18  ;;  %v39_v21 = vsub.s32 1, %v2974_v18  ;;  %v47_v29 = vsub.s32 3, %v2974_v18  ;;  %v2464_v49 = vld [vmem:[%s3536_s3 + $0x3fc] ss:$28 sps:$4 sm:$0xff]  }
  0x56   :  { %v2462_v51 = vld [vmem:[%s3536_s3 + $0x3f8] ss:$28 sps:$4 sm:$0xff]   ;;  %v2465_v55 = vld [vmem:[%s3536_s3 + $0x428] ss:$28 sps:$4 sm:$0xff]   ;;  %v2468_v56 = vld [vmem:[%s3536_s3 + $0x430] ss:$28 sps:$4 sm:$0xff]  }
  0x57   :  { %v36_v22 = vrot.slane %v2980_v20, %v35_v19  ;;  %v40_v23 = vrot.slane %v2980_v20, %v39_v21  ;;  %v48_v33 = vrot.slane %v2980_v20, %v47_v29  ;;  %v2470_v54 = vld [vmem:[%s3536_s3 + $0x434] ss:$28 sps:$4 sm:$0xff]   ;;  %v2473_v57 = vld [vmem:[%s3536_s3 + $0x464] ss:$28 sps:$4 sm:$0xff]   ;;  %v2476_v58 = vld [vmem:[%s3536_s3 + $0x46c] ss:$28 sps:$4 sm:$0xff]  }
  0x58   :  { %v2471_v59 = vld [vmem:[%s3536_s3 + $0x460] ss:$28 sps:$4 sm:$0xff]   ;;  %v2474_v60 = vld [vmem:[%s3536_s3 + $0x468] ss:$28 sps:$4 sm:$0xff]   ;;  %v2477_v63 = vld [vmem:[%s3536_s3 + $0x498] ss:$28 sps:$4 sm:$0xff]  }
  0x59   :  { %v2479_v61 = vld [vmem:[%s3536_s3 + $0x49c] ss:$28 sps:$4 sm:$0xff]   ;;  %v2482_v62 = vld [vmem:[%s3536_s3 + $0x4a4] ss:$28 sps:$4 sm:$0xff]   ;;  %v2485_v1 = vld [vmem:[%s3536_s3 + $0x4d4] ss:$28 sps:$4 sm:$0xff]  }
  0x5a   :  { %v2480_v0 = vld [vmem:[%s3536_s3 + $0x4a0] ss:$28 sps:$4 sm:$0xff]   ;;  %v2483_v3 = vld [vmem:[%s3536_s3 + $0x4d0] ss:$28 sps:$4 sm:$0xff]   ;;  %v2486_v4 = vld [vmem:[%s3536_s3 + $0x4d8] ss:$28 sps:$4 sm:$0xff]  }
  0x5b   :  { %v2488_v2 = vld [vmem:[%s3536_s3 + $0x4dc] ss:$28 sps:$4 sm:$0xff]   ;;  %v2491_v5 = vld [vmem:[%s3536_s3 + $0x50c] ss:$28 sps:$4 sm:$0xff]   ;;  %v2494_v6 = vld [vmem:[%s3536_s3 + $0x514] ss:$28 sps:$4 sm:$0xff]  }
  0x5c   :  { %v2489_v7 = vld [vmem:[%s3536_s3 + $0x508] ss:$28 sps:$4 sm:$0xff]   ;;  %v2492_v8 = vld [vmem:[%s3536_s3 + $0x510] ss:$28 sps:$4 sm:$0xff]   ;;  %v2495_v11 = vld [vmem:[%s3536_s3 + $0x540] ss:$28 sps:$4 sm:$0xff]  }
  0x5d   :  { %v2497_v9 = vld [vmem:[%s3536_s3 + $0x544] ss:$28 sps:$4 sm:$0xff]   ;;  %v2500_v10 = vld [vmem:[%s3536_s3 + $0x54c] ss:$28 sps:$4 sm:$0xff]   ;;  %v2503_v13 = vld [vmem:[%s3536_s3 + $0x57c] ss:$28 sps:$4 sm:$0xff]  }
  0x5e   :  { %v2498_v12 = vld [vmem:[%s3536_s3 + $0x548] ss:$28 sps:$4 sm:$0xff]   ;;  %v2501_v15 = vld [vmem:[%s3536_s3 + $0x578] ss:$28 sps:$4 sm:$0xff]   ;;  %v2504_v16 = vld [vmem:[%s3536_s3 + $0x580] ss:$28 sps:$4 sm:$0xff]  }
  0x5f   :  { %v2506_v14 = vld [vmem:[%s3536_s3 + $0x584] ss:$28 sps:$4 sm:$0xff]   ;;  %v2509_v17 = vld [vmem:[%s3536_s3 + $0x5b4] ss:$28 sps:$4 sm:$0xff]  }
  0xdd   :  { %v134_v24 = vpop.f32.mrb[0].mxu1 }
  0xde   :  { %v135_v25 = vadd.f32 %v134_v24, %v36_v22  ;;  %v136_v26 = vpop.f32.mrb[1].mxu1  ;;  %v2512_v22 = vld [vmem:[%s3536_s3 + $0x5bc] ss:$28 sps:$4 sm:$0xff]   ;;  %v2507_v24 = vld [vmem:[%s3536_s3 + $0x5b0] ss:$28 sps:$4 sm:$0xff]  }
  0xdf   :  { %v137_v27 = vadd.f32 %v136_v26, %v40_v23  ;;  %v138_v28 = vpop.f32.mrb[2].mxu1  ;;  %v43_v23 = vsub.s32 2, %v2974_v18 }
  0xe0   :  { %v182_v30 = vpack.c.bf16 %v135_v25, %v135_v25  ;;  %v139_v31 = vpop.f32.mrb[3].mxu1  ;;  %v2510_v25 = vld [vmem:[%s3536_s3 + $0x5b8] ss:$28 sps:$4 sm:$0xff]  }
  0xe1   :  { %v183_v32 = vpack.c.bf16 %v137_v27, %v137_v27  ;;  %v44_v26 = vrot.slane %v2980_v20, %v43_v23  ;;  %v2515_v27 = vld [vmem:[%s3536_s3 + $0x5ec] ss:$28 sps:$4 sm:$0xff]   ;;  %v2518_v28 = vld [vmem:[%s3536_s3 + $0x5f4] ss:$28 sps:$4 sm:$0xff]  }
  0xe2   :  { %v2516_v31 = vld [vmem:[%s3536_s3 + $0x5f0] ss:$28 sps:$4 sm:$0xff]  }
  0xe3   :  { %2671 = vtanh.bf16 %v183_v32  ;;  %v2521_v32 = vld [vmem:[%s3536_s3 + $0x624] ss:$28 sps:$4 sm:$0xff]  }
  0xe4   :  { %2673 = vtanh.bf16 %v182_v30  ;;  %v2513_v30 = vld [vmem:[%s3536_s3 + $0x5e8] ss:$28 sps:$4 sm:$0xff]  }
  0xe5   :  { %v2993_v34 = vpop.f32.mrb[4].mxu1 }
  0xe6   :  { %v177_v35 = vpop.f32.mrb[5].mxu1  ;;  %v176_v20 = vadd.f32 %v2993_v34, %v44_v26  ;;  %v2522_v34 = vld [vmem:[%s3536_s3 + $0x628] ss:$28 sps:$4 sm:$0xff]   ;;  %v2586_v26 = vld [vmem:[%s3536_s3 + $0x558] ss:$28 sps:$4 sm:$0xff]  }
  0xe7   :  { %v178_v36 = vadd.f32 %v177_v35, %v48_v33  ;;  %v179_v37 = vpop.f32.mrb[6].mxu1  ;;  %v2524_v33 = vld [vmem:[%s3536_s3 + $0x62c] ss:$28 sps:$4 sm:$0xff]   ;;  %v2519_v35 = vld [vmem:[%s3536_s3 + $0x620] ss:$28 sps:$4 sm:$0xff]  }
  0xe8   :  { %v180_v38 = vpop.f32.mrb[7].mxu1  ;;  %v2527_v37 = vld [vmem:[%s3536_s3 + $0x65c] ss:$28 sps:$4 sm:$0xff]  }
  0xe9   :  { %v185_v39 = vpack.c.bf16 %v178_v36, %v178_v36  ;;  %v184_v36 = vpack.c.bf16 %v176_v20, %v176_v20  ;;  %v2530_v38 = vld [vmem:[%s3536_s3 + $0x664] ss:$28 sps:$4 sm:$0xff]  }
  0xea   :  { %v2588_v20 = vld [vmem:[%s3536_s3 + $0x208] ss:$28 sps:$4 sm:$0xff]  }
  0xeb   :  { %2675 = vtanh.bf16 %v185_v39  ;;  %v2525_v39 = vld [vmem:[%s3536_s3 + $0x658] ss:$28 sps:$4 sm:$0xff]  }
  0xec   :  { %2677 = vtanh.bf16 %v184_v36  ;;  %v2597_v36 = vld [vmem:[%s3536_s3 + $0x408] ss:$28 sps:$4 sm:$0xff]  }
  0xee   :  { %v3001_v42 = vpop.eup %2671 }
  0xef   :  { %v3009_v45 = vpop.eup %2673  ;;  %1667 = vmatprep.mubr.bf16.mxu0 %v3001_v42  ;;  %1749 = vmatprep.mubr.bf16.mxu1 %v3001_v42 }
  0xf0   :  { %1668 = vmatmul.mubr.bf16.vlgmr.msra.gmra.mrb[0].mxu0 %v3009_v45  ;;  %1750 = vmatmul.mubr.bf16.vlgmr.msra.gmra.mrb[8].mxu1 %v3009_v45 }
  0xf1   :  { %1677 = vmatpush1.bf16.msra.mxu0 %v2447_v40  ;;  %1759 = vmatpush1.bf16.msra.mxu1 %v2450_v41  ;;  %v2528_v40 = vld [vmem:[%s3536_s3 + $0x660] ss:$28 sps:$4 sm:$0xff]   ;;  %v2533_v41 = vld [vmem:[%s3536_s3 + $0x694] ss:$28 sps:$4 sm:$0xff]  }
  0xf2   :  { %1678 = vmatprep.subr.bf16.mxu0 %v2455_v43  ;;  %1760 = vmatprep.subr.bf16.mxu1 %v2458_v44  ;;  %v2536_v43 = vld [vmem:[%s3536_s3 + $0x69c] ss:$28 sps:$4 sm:$0xff]   ;;  %v2531_v44 = vld [vmem:[%s3536_s3 + $0x690] ss:$28 sps:$4 sm:$0xff]  }
  0xf5   :  { %1679 = vmatpush1.bf16.msra.mxu0 %v2453_v46  ;;  %1761 = vmatpush1.bf16.msra.mxu1 %v2456_v47  ;;  %v2534_v46 = vld [vmem:[%s3536_s3 + $0x698] ss:$28 sps:$4 sm:$0xff]   ;;  %v2539_v47 = vld [vmem:[%s3536_s3 + $0x6cc] ss:$28 sps:$4 sm:$0xff]  }
  0xf6   :  { %v3033_v52 = vpop.eup %2675  ;;  %1680 = vmatprep.subr.bf16.mxu0 %v2461_v48  ;;  %1762 = vmatprep.subr.bf16.mxu1 %v2464_v49  ;;  %v2542_v48 = vld [vmem:[%s3536_s3 + $0x6d4] ss:$28 sps:$4 sm:$0xff]   ;;  %v2537_v49 = vld [vmem:[%s3536_s3 + $0x6c8] ss:$28 sps:$4 sm:$0xff]  }
  0xf7   :  { %1708 = vmatprep.mubr.bf16.mxu0 %v3033_v52  ;;  %1790 = vmatprep.mubr.bf16.mxu1 %v3033_v52 }
  0xf9   :  { %1681 = vmatpush1.bf16.msra.mxu0 %v2459_v50  ;;  %1763 = vmatpush1.bf16.msra.mxu1 %v2462_v51  ;;  %v2540_v50 = vld [vmem:[%s3536_s3 + $0x6d0] ss:$28 sps:$4 sm:$0xff]  }
  0xfa   :  { %1682 = vmatprep.subr.bf16.mxu0 %v2467_v53  ;;  %1764 = vmatprep.subr.bf16.mxu1 %v2470_v54  ;;  %v2545_v51 = vld [vmem:[%s3536_s3 + $0x14] ss:$28 sps:$4 sm:$0xff]   ;;  %v3204_v54 = vpop.eup %2677 }
  0xfb   :  { %v2546_v53 = vld [vmem:[%s3536_s3 + $0x1d8] ss:$28 sps:$4 sm:$0xff]  }
  0xfd   :  { %1683 = vmatpush1.bf16.msra.mxu0 %v2465_v55  ;;  %1765 = vmatpush1.bf16.msra.mxu1 %v2468_v56  ;;  %v2543_v55 = vld [vmem:[%s3536_s3 + $0x10] ss:$28 sps:$4 sm:$0xff]   ;;  %v2547_v56 = vld [vmem:[%s3536_s3 + $0x18] ss:$28 sps:$4 sm:$0xff]  }
  0xfe   :  { %1684 = vmatprep.subr.bf16.mxu0 %v2473_v57  ;;  %1766 = vmatprep.subr.bf16.mxu1 %v2476_v58  ;;  %v2550_v57 = vld [vmem:[%s3536_s3 + $0x4c] ss:$28 sps:$4 sm:$0xff]  }
  0xff   :  { %v2551_v58 = vld [vmem:[%s3536_s3 + $0x210] ss:$28 sps:$4 sm:$0xff]  }
 0x101   :  { %1685 = vmatpush1.bf16.msra.mxu0 %v2471_v59  ;;  %1767 = vmatpush1.bf16.msra.mxu1 %v2474_v60  ;;  %v2548_v59 = vld [vmem:[%s3536_s3 + $0x48] ss:$28 sps:$4 sm:$0xff]   ;;  %v2552_v60 = vld [vmem:[%s3536_s3 + $0x50] ss:$28 sps:$4 sm:$0xff]  }
 0x102   :  { %1686 = vmatprep.subr.bf16.mxu0 %v2479_v61  ;;  %1768 = vmatprep.subr.bf16.mxu1 %v2482_v62  ;;  %v2555_v61 = vld [vmem:[%s3536_s3 + $0x84] ss:$28 sps:$4 sm:$0xff]  }
 0x103   :  { %v2556_v62 = vld [vmem:[%s3536_s3 + $0x248] ss:$28 sps:$4 sm:$0xff]  }
 0x105   :  { %1687 = vmatpush1.bf16.msra.mxu0 %v2477_v63  ;;  %1769 = vmatpush1.bf16.msra.mxu1 %v2480_v0  ;;  %v2553_v63 = vld [vmem:[%s3536_s3 + $0x80] ss:$28 sps:$4 sm:$0xff]  }
 0x106   :  { %1688 = vmatprep.subr.bf16.mxu0 %v2485_v1  ;;  %1770 = vmatprep.subr.bf16.mxu1 %v2488_v2  ;;  %v2560_v0 = vld [vmem:[%s3536_s3 + $0xbc] ss:$28 sps:$4 sm:$0xff]  }
 0x107   :  { %v2561_v1 = vld [vmem:[%s3536_s3 + $0x280] ss:$28 sps:$4 sm:$0xff]   ;;  %v2558_v2 = vld [vmem:[%s3536_s3 + $0xb8] ss:$28 sps:$4 sm:$0xff]  }
 0x109   :  { %1689 = vmatpush1.bf16.msra.mxu0 %v2483_v3  ;;  %1771 = vmatpush1.bf16.msra.mxu1 %v2486_v4  ;;  %v2562_v3 = vld [vmem:[%s3536_s3 + $0xc0] ss:$28 sps:$4 sm:$0xff]   ;;  %v2565_v4 = vld [vmem:[%s3536_s3 + $0xf4] ss:$28 sps:$4 sm:$0xff]  }
 0x10a   :  { %1690 = vmatprep.subr.bf16.mxu0 %v2491_v5  ;;  %1772 = vmatprep.subr.bf16.mxu1 %v2494_v6  ;;  %v2566_v5 = vld [vmem:[%s3536_s3 + $0x2b8] ss:$28 sps:$4 sm:$0xff]   ;;  %v2563_v6 = vld [vmem:[%s3536_s3 + $0xf0] ss:$28 sps:$4 sm:$0xff]  }
 0x10d   :  { %1691 = vmatpush1.bf16.msra.mxu0 %v2489_v7  ;;  %1773 = vmatpush1.bf16.msra.mxu1 %v2492_v8  ;;  %v2567_v7 = vld [vmem:[%s3536_s3 + $0xf8] ss:$28 sps:$4 sm:$0xff]   ;;  %v2570_v8 = vld [vmem:[%s3536_s3 + $0x12c] ss:$28 sps:$4 sm:$0xff]  }
 0x10e   :  { %1692 = vmatprep.subr.bf16.mxu0 %v2497_v9  ;;  %1774 = vmatprep.subr.bf16.mxu1 %v2500_v10  ;;  %v2571_v9 = vld [vmem:[%s3536_s3 + $0x2f0] ss:$28 sps:$4 sm:$0xff]   ;;  %v2568_v10 = vld [vmem:[%s3536_s3 + $0x128] ss:$28 sps:$4 sm:$0xff]  }
 0x111   :  { %1693 = vmatpush1.bf16.msra.mxu0 %v2495_v11  ;;  %1775 = vmatpush1.bf16.msra.mxu1 %v2498_v12  ;;  %v2572_v11 = vld [vmem:[%s3536_s3 + $0x130] ss:$28 sps:$4 sm:$0xff]   ;;  %v2575_v12 = vld [vmem:[%s3536_s3 + $0x164] ss:$28 sps:$4 sm:$0xff]  }
 0x112   :  { %1694 = vmatprep.subr.bf16.mxu0 %v2503_v13  ;;  %1776 = vmatprep.subr.bf16.mxu1 %v2506_v14  ;;  %v2576_v13 = vld [vmem:[%s3536_s3 + $0x328] ss:$28 sps:$4 sm:$0xff]   ;;  %v2573_v14 = vld [vmem:[%s3536_s3 + $0x160] ss:$28 sps:$4 sm:$0xff]  }
 0x115   :  { %1695 = vmatpush1.bf16.msra.mxu0 %v2501_v15  ;;  %1777 = vmatpush1.bf16.msra.mxu1 %v2504_v16  ;;  %v2577_v15 = vld [vmem:[%s3536_s3 + $0x168] ss:$28 sps:$4 sm:$0xff]   ;;  %v2580_v16 = vld [vmem:[%s3536_s3 + $0x19c] ss:$28 sps:$4 sm:$0xff]  }
 0x116   :  { %1696 = vmatprep.subr.bf16.mxu0 %v2509_v17  ;;  %1778 = vmatprep.subr.bf16.mxu1 %v2512_v22  ;;  %v2581_v17 = vld [vmem:[%s3536_s3 + $0x360] ss:$28 sps:$4 sm:$0xff]   ;;  %v2578_v22 = vld [vmem:[%s3536_s3 + $0x198] ss:$28 sps:$4 sm:$0xff]  }
 0x119   :  { %1697 = vmatpush1.bf16.msra.mxu0 %v2507_v24  ;;  %1779 = vmatpush1.bf16.msra.mxu1 %v2510_v25  ;;  %v2582_v24 = vld [vmem:[%s3536_s3 + $0x1a0] ss:$28 sps:$4 sm:$0xff]   ;;  %v2585_v25 = vld [vmem:[%s3536_s3 + $0x1d4] ss:$28 sps:$4 sm:$0xff]  }
 0x11a   :  { %1698 = vmatprep.subr.bf16.mxu0 %v2515_v27  ;;  %1780 = vmatprep.subr.bf16.mxu1 %v2518_v28  ;;  %v2583_v27 = vld [vmem:[%s3536_s3 + $0x1d0] ss:$28 sps:$4 sm:$0xff]   ;;  %v2587_v28 = vld [vmem:[%s3536_s3 + $0x398] ss:$28 sps:$4 sm:$0xff]  }
 0x11d   :  { %1699 = vmatpush1.bf16.msra.mxu0 %v2513_v30  ;;  %1781 = vmatpush1.bf16.msra.mxu1 %v2516_v31  ;;  %v2590_v30 = vld [vmem:[%s3536_s3 + $0x20c] ss:$28 sps:$4 sm:$0xff]  }
 0x11e   :  { %1700 = vmatprep.subr.bf16.mxu0 %v2521_v32  ;;  %1782 = vmatprep.subr.bf16.mxu1 %v2524_v33  ;;  %v2591_v31 = vld [vmem:[%s3536_s3 + $0x590] ss:$28 sps:$4 sm:$0xff]   ;;  %v2595_v33 = vld [vmem:[%s3536_s3 + $0x244] ss:$28 sps:$4 sm:$0xff]  }
 0x11f   :  { %v2592_v32 = vld [vmem:[%s3536_s3 + $0x3d0] ss:$28 sps:$4 sm:$0xff]  }
 0x121   :  { %1701 = vmatpush1.bf16.msra.mxu0 %v2519_v35  ;;  %1783 = vmatpush1.bf16.msra.mxu1 %v2522_v34  ;;  %v2596_v35 = vld [vmem:[%s3536_s3 + $0x5c8] ss:$28 sps:$4 sm:$0xff]   ;;  %v2593_v34 = vld [vmem:[%s3536_s3 + $0x240] ss:$28 sps:$4 sm:$0xff]  }
 0x122   :  { %1702 = vmatprep.subr.bf16.mxu0 %v2527_v37  ;;  %1784 = vmatprep.subr.bf16.mxu1 %v2530_v38  ;;  %v2600_v37 = vld [vmem:[%s3536_s3 + $0x27c] ss:$28 sps:$4 sm:$0xff]  }
 0x123   :  { %v2601_v38 = vld [vmem:[%s3536_s3 + $0x600] ss:$28 sps:$4 sm:$0xff]  }
 0x125   :  { %1703 = vmatpush1.bf16.msra.mxu0 %v2525_v39  ;;  %1785 = vmatpush1.bf16.msra.mxu1 %v2528_v40  ;;  %v2598_v39 = vld [vmem:[%s3536_s3 + $0x278] ss:$28 sps:$4 sm:$0xff]   ;;  %v2602_v40 = vld [vmem:[%s3536_s3 + $0x440] ss:$28 sps:$4 sm:$0xff]  }
 0x126   :  { %1704 = vmatprep.subr.bf16.mxu0 %v2533_v41  ;;  %1786 = vmatprep.subr.bf16.mxu1 %v2536_v43  ;;  %v2605_v41 = vld [vmem:[%s3536_s3 + $0x2b4] ss:$28 sps:$4 sm:$0xff]  }
 0x127   :  { %v2606_v43 = vld [vmem:[%s3536_s3 + $0x638] ss:$28 sps:$4 sm:$0xff]  }
 0x129   :  { %1705 = vmatpush1.bf16.msra.mxu0 %v2531_v44  ;;  %1787 = vmatpush1.bf16.msra.mxu1 %v2534_v46  ;;  %v2603_v44 = vld [vmem:[%s3536_s3 + $0x2b0] ss:$28 sps:$4 sm:$0xff]   ;;  %v2607_v46 = vld [vmem:[%s3536_s3 + $0x478] ss:$28 sps:$4 sm:$0xff]  }
 0x12a   :  { %1706 = vmatprep.subr.bf16.mxu0 %v2539_v47  ;;  %1788 = vmatprep.subr.bf16.mxu1 %v2542_v48  ;;  %v2610_v47 = vld [vmem:[%s3536_s3 + $0x2ec] ss:$28 sps:$4 sm:$0xff]  }
 0x12b   :  { %v2611_v48 = vld [vmem:[%s3536_s3 + $0x670] ss:$28 sps:$4 sm:$0xff]  }
 0x12d   :  { %1707 = vmatpush1.bf16.msra.mxu0 %v2537_v49  ;;  %1789 = vmatpush1.bf16.msra.mxu1 %v2540_v50  ;;  %v2608_v49 = vld [vmem:[%s3536_s3 + $0x2e8] ss:$28 sps:$4 sm:$0xff]   ;;  %v2612_v50 = vld [vmem:[%s3536_s3 + $0x4b0] ss:$28 sps:$4 sm:$0xff]  }
 0x12e   :  { %1799 = vmatprep.subr.bf16.mxu0 %v2545_v51  ;;  %2277 = vmatprep.subr.bf16.mxu1 %v2546_v53  ;;  %v2615_v51 = vld [vmem:[%s3536_s3 + $0x324] ss:$28 sps:$4 sm:$0xff]  }
 0x12f   :  { %v2616_v53 = vld [vmem:[%s3536_s3 + $0x6a8] ss:$28 sps:$4 sm:$0xff]  }
 0x130   :  { %1709 = vmatmul.mubr.bf16.vlgmr.msra.gmra.mrb[0].mxu0 %v3204_v54  ;;  %1791 = vmatmul.mubr.bf16.vlgmr.msra.gmra.mrb[8].mxu1 %v3204_v54 }
 0x131   :  { %1800 = vmatpush1.bf16.msra.mxu0 %v2543_v55  ;;  %1831 = vmatprep.mubr.bf16.mxu0 %v3001_v42  ;;  %v2613_v55 = vld [vmem:[%s3536_s3 + $0x320] ss:$28 sps:$4 sm:$0xff]  }
 0x132   :  { %2278 = vmatpush3.bf16.msra.mxu1 %v2547_v56  ;;  %1913 = vmatprep.mubr.bf16.mxu1 %v3001_v42  ;;  %v2557_v42 = vld [vmem:[%s3536_s3 + $0x88] ss:$28 sps:$4 sm:$0xff]  }
 0x133   :  { %1801 = vmatprep.subr.bf16.mxu0 %v2550_v57  ;;  %2279 = vmatprep.subr.bf16.mxu1 %v2551_v58  ;;  %v2617_v56 = vld [vmem:[%s3536_s3 + $0x4e8] ss:$28 sps:$4 sm:$0xff]   ;;  %v2620_v57 = vld [vmem:[%s3536_s3 + $0x35c] ss:$28 sps:$4 sm:$0xff]  }
 0x134   :  { %v2621_v58 = vld [vmem:[%s3536_s3 + $0x6e0] ss:$28 sps:$4 sm:$0xff]  }
 0x135   :  { %1802 = vmatpush1.bf16.msra.mxu0 %v2548_v59  ;;  %v2618_v59 = vld [vmem:[%s3536_s3 + $0x358] ss:$28 sps:$4 sm:$0xff]  }
 0x136   :  { %2280 = vmatpush3.bf16.msra.mxu1 %v2552_v60  ;;  %1803 = vmatprep.subr.bf16.mxu0 %v2555_v61  ;;  %v2622_v60 = vld [vmem:[%s3536_s3 + $0x520] ss:$28 sps:$4 sm:$0xff]   ;;  %v2625_v61 = vld [vmem:[%s3536_s3 + $0x394] ss:$28 sps:$4 sm:$0xff]  }
 0x137   :  { %2281 = vmatprep.subr.bf16.mxu1 %v2556_v62  ;;  %v2623_v62 = vld [vmem:[%s3536_s3 + $0x390] ss:$28 sps:$4 sm:$0xff]  }
 0x139   :  { %1804 = vmatpush1.bf16.msra.mxu0 %v2553_v63  ;;  %v2628_v63 = vld [vmem:[%s3536_s3 + $0x3cc] ss:$28 sps:$4 sm:$0xff]  }
 0x13a   :  { %2282 = vmatpush3.bf16.msra.mxu1 %v2557_v42  ;;  %1805 = vmatprep.subr.bf16.mxu0 %v2560_v0  ;;  %v2626_v42 = vld [vmem:[%s3536_s3 + $0x3c8] ss:$28 sps:$4 sm:$0xff]  }
 0x13b   :  { %2283 = vmatprep.subr.bf16.mxu1 %v2561_v1  ;;  %v2631_v0 = vld [vmem:[%s3536_s3 + $0x404] ss:$28 sps:$4 sm:$0xff]  }
 0x13c   :  { %v2629_v1 = vld [vmem:[%s3536_s3 + $0x400] ss:$28 sps:$4 sm:$0xff]  }
 0x13d   :  { %1806 = vmatpush1.bf16.msra.mxu0 %v2558_v2  ;;  %v2637_v2 = vld [vmem:[%s3536_s3 + $0x474] ss:$28 sps:$4 sm:$0xff]  }
 0x13e   :  { %2284 = vmatpush3.bf16.msra.mxu1 %v2562_v3  ;;  %1807 = vmatprep.subr.bf16.mxu0 %v2565_v4  ;;  %v2635_v3 = vld [vmem:[%s3536_s3 + $0x470] ss:$28 sps:$4 sm:$0xff]  }
 0x13f   :  { %2285 = vmatprep.subr.bf16.mxu1 %v2566_v5  ;;  %v2640_v4 = vld [vmem:[%s3536_s3 + $0x4ac] ss:$28 sps:$4 sm:$0xff]  }
 0x140   :  { %v2638_v5 = vld [vmem:[%s3536_s3 + $0x4a8] ss:$28 sps:$4 sm:$0xff]  }
 0x141   :  { %1808 = vmatpush1.bf16.msra.mxu0 %v2563_v6  ;;  %v2643_v6 = vld [vmem:[%s3536_s3 + $0x4e4] ss:$28 sps:$4 sm:$0xff]  }
 0x142   :  { %2286 = vmatpush3.bf16.msra.mxu1 %v2567_v7  ;;  %1809 = vmatprep.subr.bf16.mxu0 %v2570_v8  ;;  %v2641_v7 = vld [vmem:[%s3536_s3 + $0x4e0] ss:$28 sps:$4 sm:$0xff]  }
 0x143   :  { %2287 = vmatprep.subr.bf16.mxu1 %v2571_v9  ;;  %v2646_v8 = vld [vmem:[%s3536_s3 + $0x51c] ss:$28 sps:$4 sm:$0xff]  }
 0x144   :  { %v2644_v9 = vld [vmem:[%s3536_s3 + $0x518] ss:$28 sps:$4 sm:$0xff]  }
 0x145   :  { %1810 = vmatpush1.bf16.msra.mxu0 %v2568_v10  ;;  %v2649_v10 = vld [vmem:[%s3536_s3 + $0x554] ss:$28 sps:$4 sm:$0xff]  }
 0x146   :  { %2288 = vmatpush3.bf16.msra.mxu1 %v2572_v11  ;;  %1811 = vmatprep.subr.bf16.mxu0 %v2575_v12  ;;  %v2647_v11 = vld [vmem:[%s3536_s3 + $0x550] ss:$28 sps:$4 sm:$0xff]  }
 0x147   :  { %2289 = vmatprep.subr.bf16.mxu1 %v2576_v13  ;;  %v2652_v12 = vld [vmem:[%s3536_s3 + $0x58c] ss:$28 sps:$4 sm:$0xff]  }
 0x148   :  { %v2650_v13 = vld [vmem:[%s3536_s3 + $0x588] ss:$28 sps:$4 sm:$0xff]  }
 0x149   :  { %1812 = vmatpush1.bf16.msra.mxu0 %v2573_v14  ;;  %v2655_v14 = vld [vmem:[%s3536_s3 + $0x5c4] ss:$28 sps:$4 sm:$0xff]  }
 0x14a   :  { %2290 = vmatpush3.bf16.msra.mxu1 %v2577_v15  ;;  %1813 = vmatprep.subr.bf16.mxu0 %v2580_v16  ;;  %v2653_v15 = vld [vmem:[%s3536_s3 + $0x5c0] ss:$28 sps:$4 sm:$0xff]  }
 0x14b   :  { %2291 = vmatprep.subr.bf16.mxu1 %v2581_v17  ;;  %v2658_v16 = vld [vmem:[%s3536_s3 + $0x5fc] ss:$28 sps:$4 sm:$0xff]  }
 0x14c   :  { %v2656_v17 = vld [vmem:[%s3536_s3 + $0x5f8] ss:$28 sps:$4 sm:$0xff]  }
 0x14d   :  { %1814 = vmatpush1.bf16.msra.mxu0 %v2578_v22  ;;  %v2661_v22 = vld [vmem:[%s3536_s3 + $0x634] ss:$28 sps:$4 sm:$0xff]  }
 0x14e   :  { %2292 = vmatpush3.bf16.msra.mxu1 %v2582_v24  ;;  %1815 = vmatprep.subr.bf16.mxu0 %v2585_v25  ;;  %v2659_v24 = vld [vmem:[%s3536_s3 + $0x630] ss:$28 sps:$4 sm:$0xff]  }
 0x14f   :  { %2299 = vmatprep.subr.bf16.mxu1 %v2586_v26  ;;  %v2664_v25 = vld [vmem:[%s3536_s3 + $0x66c] ss:$28 sps:$4 sm:$0xff]  }
 0x150   :  { %v2662_v26 = vld [vmem:[%s3536_s3 + $0x668] ss:$28 sps:$4 sm:$0xff]  }
 0x151   :  { %1914 = vmatmul.mubr.bf16.vlgmr.msra.gmra.mrb[12].mxu1 %v3009_v45  ;;  %1816 = vmatpush1.bf16.msra.mxu0 %v2583_v27  ;;  %v2667_v27 = vld [vmem:[%s3536_s3 + $0x6a4] ss:$28 sps:$4 sm:$0xff]  }
 0x152   :  { %2300 = vmatpush3.bf16.msra.mxu1 %v2587_v28  ;;  %1953 = vmatprep.mubr.bf16.mxu1 %v3033_v52  ;;  %v2665_v28 = vld [vmem:[%s3536_s3 + $0x6a0] ss:$28 sps:$4 sm:$0xff]  }
 0x153   :  { %1817 = vmatprep.subr.bf16.mxu0 %v2590_v30  ;;  %2301 = vmatprep.subr.bf16.mxu1 %v2591_v31  ;;  %v2670_v30 = vld [vmem:[%s3536_s3 + $0x6dc] ss:$28 sps:$4 sm:$0xff]  }
 0x154   :  { %v2668_v31 = vld [vmem:[%s3536_s3 + $0x6d8] ss:$28 sps:$4 sm:$0xff]  }
 0x155   :  { %1818 = vmatpush1.bf16.msra.mxu0 %v2588_v20  ;;  %v3501_v20 = vld [vmem:[%s3537_s4] sm:$0x7f] }
 0x156   :  { %2302 = vmatpush3.bf16.msra.mxu1 %v2592_v32  ;;  %1819 = vmatprep.subr.bf16.mxu0 %v2595_v33  ;;  %v451_v32 = vrot.slane %v3501_v20, %v35_v19  ;;  %v459_v33 = vrot.slane %v3501_v20, %v43_v23 }
 0x157   :  { %2303 = vmatprep.subr.bf16.mxu1 %v2596_v35  ;;  %v455_v35 = vrot.slane %v3501_v20, %v39_v21 }
 0x159   :  { %1820 = vmatpush1.bf16.msra.mxu0 %v2593_v34 }
 0x15a   :  { %2304 = vmatpush3.bf16.msra.mxu1 %v2597_v36  ;;  %1821 = vmatprep.subr.bf16.mxu0 %v2600_v37 }
 0x15b   :  { %2305 = vmatprep.subr.bf16.mxu1 %v2601_v38 }
 0x15d   :  { %1822 = vmatpush1.bf16.msra.mxu0 %v2598_v39 }
 0x15e   :  { %2306 = vmatpush3.bf16.msra.mxu1 %v2602_v40  ;;  %1823 = vmatprep.subr.bf16.mxu0 %v2605_v41 }
 0x15f   :  { %2307 = vmatprep.subr.bf16.mxu1 %v2606_v43 }
 0x161   :  { %1824 = vmatpush1.bf16.msra.mxu0 %v2603_v44 }
 0x162   :  { %2308 = vmatpush3.bf16.msra.mxu1 %v2607_v46  ;;  %1825 = vmatprep.subr.bf16.mxu0 %v2610_v47 }
 0x163   :  { %2309 = vmatprep.subr.bf16.mxu1 %v2611_v48 }
 0x165   :  { %1826 = vmatpush1.bf16.msra.mxu0 %v2608_v49 }
 0x166   :  { %2310 = vmatpush3.bf16.msra.mxu1 %v2612_v50  ;;  %1827 = vmatprep.subr.bf16.mxu0 %v2615_v51 }
 0x167   :  { %2311 = vmatprep.subr.bf16.mxu1 %v2616_v53 }
 0x169   :  { %1828 = vmatpush1.bf16.msra.mxu0 %v2613_v55 }
 0x16a   :  { %2312 = vmatpush3.bf16.msra.mxu1 %v2617_v56  ;;  %1829 = vmatprep.subr.bf16.mxu0 %v2620_v57 }
 0x16b   :  { %2313 = vmatprep.subr.bf16.mxu1 %v2621_v58 }
 0x16d   :  { %1830 = vmatpush1.bf16.msra.mxu0 %v2618_v59 }
 0x16e   :  { %2314 = vmatpush3.bf16.msra.mxu1 %v2622_v60  ;;  %1840 = vmatprep.subr.bf16.mxu0 %v2625_v61 }
 0x170   :  { %1832 = vmatmul.mubr.bf16.vlgmr.msra.gmra.mrb[4].mxu0 %v3009_v45  ;;  %v2634_v45 = vld [vmem:[%s3536_s3 + $0x43c] ss:$28 sps:$4 sm:$0xff]  }
 0x171   :  { %1954 = vmatmul.mubr.bf16.vlgmr.msra.gmra.mrb[16].mxu1 %v3204_v54  ;;  %1841 = vmatpush1.bf16.msra.mxu0 %v2623_v62 }
 0x172   :  { %1872 = vmatprep.mubr.bf16.mxu0 %v3033_v52  ;;  %1842 = vmatprep.subr.bf16.mxu0 %v2628_v63  ;;  %v2632_v52 = vld [vmem:[%s3536_s3 + $0x438] ss:$28 sps:$4 sm:$0xff]   ;;  %s2718_s3 = smov [#allocation2]  }
 0x173   :  { %s2029_s4 = sshll.u32 %s2718_s3, 4  ;;  %s2030_s4 = int_to_ptr.vmem [resolvable:$true] %s2029_s4 }
 0x174   :  { %s2693_s1 = scalar_lea.vmem %s2030_s4, 448  ;;  %p2698_p1 = scmp.lt.s32.totalorder %s2030_s4, %s2030_s4 }
 0x175   :  { %1843 = vmatpush1.bf16.msra.mxu0 %v2626_v42  ;;  %p2694_p0 = scmp.ne.s32.totalorder %s2030_s4, %s2693_s1  ;;  %p2699_p2 = scmp.lt.s32.totalorder %s2693_s1, %s2693_s1 }
 0x176   :  { %1844 = vmatprep.subr.bf16.mxu0 %v2631_v0 }
 0x177   :  { %p2700_p3 = por %p2699_p2, %p2698_p1 }
 0x179   :  { %1845 = vmatpush1.bf16.msra.mxu0 %v2629_v1  ;;  %p2701_p4 = pnand %p2700_p3, %p2694_p0 }
 0x17a   :  { %1846 = vmatprep.subr.bf16.mxu0 %v2634_v45 }
 0x17d   :  { %1847 = vmatpush1.bf16.msra.mxu0 %v2632_v52 }
 0x17e   :  { %1848 = vmatprep.subr.bf16.mxu0 %v2637_v2 }
 0x181   :  { %1849 = vmatpush1.bf16.msra.mxu0 %v2635_v3 }
 0x182   :  { %1850 = vmatprep.subr.bf16.mxu0 %v2640_v4 }
 0x185   :  { %1851 = vmatpush1.bf16.msra.mxu0 %v2638_v5 }
 0x186   :  { %1852 = vmatprep.subr.bf16.mxu0 %v2643_v6 }
 0x189   :  { %1853 = vmatpush1.bf16.msra.mxu0 %v2641_v7  ;;  %v474_v7 = vsub.s32 6, %v2974_v18 }
 0x18a   :  { %1854 = vmatprep.subr.bf16.mxu0 %v2646_v8 }
 0x18b   :  { %v475_v8 = vrot.slane %v3501_v20, %v474_v7 }
 0x18d   :  { %1855 = vmatpush1.bf16.msra.mxu0 %v2644_v9 }
 0x18e   :  { %1856 = vmatprep.subr.bf16.mxu0 %v2649_v10 }
 0x191   :  { %1857 = vmatpush1.bf16.msra.mxu0 %v2647_v11 }
 0x192   :  { %1858 = vmatprep.subr.bf16.mxu0 %v2652_v12 }
 0x195   :  { %1859 = vmatpush1.bf16.msra.mxu0 %v2650_v13 }
 0x196   :  { %1860 = vmatprep.subr.bf16.mxu0 %v2655_v14 }
 0x199   :  { %1861 = vmatpush1.bf16.msra.mxu0 %v2653_v15 }
 0x19a   :  { %1862 = vmatprep.subr.bf16.mxu0 %v2658_v16 }
 0x19d   :  { %1863 = vmatpush1.bf16.msra.mxu0 %v2656_v17 }
 0x19e   :  { %1864 = vmatprep.subr.bf16.mxu0 %v2661_v22 }
 0x1a1   :  { %1865 = vmatpush1.bf16.msra.mxu0 %v2659_v24 }
 0x1a2   :  { %1866 = vmatprep.subr.bf16.mxu0 %v2664_v25 }
 0x1a5   :  { %1867 = vmatpush1.bf16.msra.mxu0 %v2662_v26 }
 0x1a6   :  { %1868 = vmatprep.subr.bf16.mxu0 %v2667_v27  ;;  %v466_v27 = vsub.s32 4, %v2974_v18 }
 0x1a9   :  { %1869 = vmatpush1.bf16.msra.mxu0 %v2665_v28  ;;  %v470_v28 = vsub.s32 5, %v2974_v18 }
 0x1aa   :  { %1870 = vmatprep.subr.bf16.mxu0 %v2670_v30  ;;  %v467_v30 = vrot.slane %v3501_v20, %v466_v27 }
 0x1ad   :  { %1871 = vmatpush1.bf16.msra.mxu0 %v2668_v31  ;;  %v471_v31 = vrot.slane %v3501_v20, %v470_v28 }
 0x1b0   :  { %1873 = vmatmul.mubr.bf16.vlgmr.msra.gmra.mrb[4].mxu0 %v3204_v54  ;;  %v463_v54 = vrot.slane %v3501_v20, %v47_v29 }
 0x203   :  { %v1710_v34 = vpop.f32.mrb[0].mxu0  ;;  %v1792_v36 = vpop.f32.mrb[8].mxu1 }
 0x204   :  { %v2321_v37 = vadd.f32 %v1710_v34, %v451_v32  ;;  %v2323_v38 = vadd.f32 %v1792_v36, %v459_v33  ;;  %v1712_v39 = vpop.f32.mrb[1].mxu0  ;;  %v1794_v40 = vpop.f32.mrb[9].mxu1 }
 0x205   :  { %v2322_v41 = vadd.f32 %v1712_v39, %v455_v35  ;;  %v2324_v19 = vadd.f32 %v1794_v40, %v463_v54  ;;  %v1714_v43 = vpop.f32.mrb[2].mxu0  ;;  %v1796_v44 = vpop.f32.mrb[10].mxu1 }
 0x206   :  { %v1961_v46 = vmul.f32 0.5, %v2321_v37  ;;  %v1963_v23 = vmul.f32 0.5, %v2323_v38  ;;  %v1715_v47 = vpop.f32.mrb[3].mxu0  ;;  %v1797_v48 = vpop.f32.mrb[11].mxu1 }
 0x207   :  { %v1962_v49 = vmul.f32 0.5, %v2322_v41  ;;  %v1964_v21 = vmul.f32 0.5, %v2324_v19 }
 0x208   :  { %v1968_v50 = vpack.c.bf16 %v1961_v46, %v1961_v46  ;;  %v1970_v51 = vpack.c.bf16 %v1963_v23, %v1963_v23 }
 0x209   :  { %v1969_v53 = vpack.c.bf16 %v1962_v49, %v1962_v49  ;;  %v1971_v29 = vpack.c.bf16 %v1964_v21, %v1964_v21 }
 0x20a   :  { %2679 = vtanh.bf16 %v1968_v50 }
 0x20b   :  { %2681 = vtanh.bf16 %v1970_v51 }
 0x20c   :  { %2683 = vtanh.bf16 %v1969_v53 }
 0x20d   :  { %2685 = vtanh.bf16 %v1971_v29 }
 0x215   :  { %v2680_v55 = vpop.eup %2679 }
 0x216   :  { %v2682_v56 = vpop.eup %2681  ;;  %v1982_v57 = vmul.bf16 1056980736, %v2680_v55 }
 0x217   :  { %v2684_v58 = vpop.eup %2683  ;;  %v1984_v59 = vmul.bf16 1056980736, %v2682_v56 }
 0x218   :  { %v2686_v60 = vpop.eup %2685  ;;  %v1989_v61 = vadd.bf16 1056980736, %v1982_v57  ;;  %v1983_v62 = vmul.bf16 1056980736, %v2684_v58 }
 0x219   :  { %v1991_v63 = vadd.bf16 1056980736, %v1984_v59  ;;  %v1985_v42 = vmul.bf16 1056980736, %v2686_v60 }
 0x21a   :  { %v1990_v0 = vadd.bf16 1056980736, %v1983_v62 }
 0x21b   :  { %v1992_v1 = vadd.bf16 1056980736, %v1985_v42 }
 0x21c   :  { %v2273_v45 = vcombine.low %v1989_v61, %v1990_v0 }
 0x21d   :  { %v2274_v52 = vcombine.low %v1991_v63, %v1992_v1 }
 0x21e   :  { %2018 = vst [vmem:[#allocation2] sm:$0xff] %v2273_v45 }
 0x21f   :  { %2019 = vst [vmem:[#allocation2 + $0x8] sm:$0xff] %v2274_v52 }
 0x224   :  { %v2293_v2 = vpop.f32.mrb[12].mxu1 }
 0x225   :  { %v2294_v3 = vpop.f32.mrb[13].mxu1 }
 0x226   :  { %v2295_v4 = vadd.f32 %v2294_v3, %v2293_v2  ;;  %v2296_v5 = vpop.f32.mrb[14].mxu1 }
 0x227   :  { %v2297_v6 = vpop.f32.mrb[15].mxu1 }
 0x228   :  { %v1916_v11 = vadd.f32 %v2295_v4, %v475_v8 }
 0x244   :  { %v2315_v9 = vpop.f32.mrb[16].mxu1 }
 0x245   :  { %v2316_v10 = vpop.f32.mrb[17].mxu1 }
 0x246   :  { %v2317_v12 = vadd.f32 %v2316_v10, %v2315_v9  ;;  %v2318_v13 = vpop.f32.mrb[18].mxu1 }
 0x247   :  { %v2319_v14 = vpop.f32.mrb[19].mxu1 }
 0x248   :  { %v1956_v15 = vadd.f32 %v2317_v12, %v1916_v11 }
 0x24a   :  { %v1967_v16 = vmul.f32 0.5, %v1956_v15 }
 0x24c   :  { %v1974_v17 = vpack.c.bf16 %v1967_v16, %v1967_v16 }
 0x24e   :  { %2687 = vtanh.bf16 %v1974_v17 }
 0x259   :  { %v2688_v22 = vpop.eup %2687 }
 0x25a   :  { %v1988_v24 = vmul.bf16 1056980736, %v2688_v22 }
 0x25c   :  { %v1995_v25 = vadd.bf16 1056980736, %v1988_v24 }
 0x25e   :  { %v2276_v26 = vcombine.low %v1995_v25, %v1995_v25 }
 0x260   :  { %2022 = vst.msk [vmem:[#allocation2 + $0x18] sm:$0xf] %vm2021_vm2, %v2276_v26 }
 0x283   :  { %v1874_v32 = vpop.f32.mrb[4].mxu0 }
 0x284   :  { %v2325_v33 = vadd.f32 %v1874_v32, %v467_v30  ;;  %v1876_v35 = vpop.f32.mrb[5].mxu0 }
 0x285   :  { %v2326_v54 = vadd.f32 %v1876_v35, %v471_v31  ;;  %v1878_v34 = vpop.f32.mrb[6].mxu0 }
 0x286   :  { %v1965_v36 = vmul.f32 0.5, %v2325_v33  ;;  %v1879_v37 = vpop.f32.mrb[7].mxu0 }
 0x287   :  { %v1966_v38 = vmul.f32 0.5, %v2326_v54 }
 0x288   :  { %v1972_v39 = vpack.c.bf16 %v1965_v36, %v1965_v36 }
 0x289   :  { %v1973_v40 = vpack.c.bf16 %v1966_v38, %v1966_v38 }
 0x28a   :  { %2689 = vtanh.bf16 %v1972_v39 }
 0x28b   :  { %2691 = vtanh.bf16 %v1973_v40 }
 0x295   :  { %v2690_v41 = vpop.eup %2689 }
 0x296   :  { %v2692_v19 = vpop.eup %2691  ;;  %v1986_v43 = vmul.bf16 1056980736, %v2690_v41 }
 0x297   :  { %v1987_v18 = vmul.bf16 1056980736, %v2692_v19 }
 0x298   :  { %v1993_v44 = vadd.bf16 1056980736, %v1986_v43 }
 0x299   :  { %v1994_v20 = vadd.bf16 1056980736, %v1987_v18 }
 0x29b   :  { %v2275_v46 = vcombine.low %v1993_v44, %v1994_v20 }
 0x29d   :  { %2020 = vst [vmem:[#allocation2 + $0x10] sm:$0xff] %v2275_v46 }
 0x29e   :  { %2704 = shalt.err (!%p2701_p4)
}
 0x29f   :  { %s2705_s16 = scalar_lea.hbm %s3538_s5, 448 }
 0x2a0   :  { %p2706_p5 = scmp.ne.s32.totalorder %s3538_s5, %s2705_s16  ;;  %p2709_p6 = scmp.lt.u32.totalorder %s2705_s16, %s3538_s5 }
 0x2a2   :  { %p2711_p7 = pnand %p2709_p6, %p2706_p5 }
 0x2a4   :  { %2714 = shalt.err (!%p2711_p7)
}
 0x2a5   :  { %2032 = dma.vmem_to_hbm [thread:$0]  %s2030_s4, 448, %s3538_s5, [#allocation3]  }
 0x2a6   :  { %2715 = dma.done.wait [#allocation3], 448  }
 0x2a7   :  { %2716 = vsyncadd [#allocation3], 4294966848 }
 0x2a8   :  { %2036 = vsyncpa [#allocation3], 1 }

</bundles_post_ra>
